<compile_context>
chip_gen: v6e
topology: v6e:2x2x1
jax: 0.10.0
libtpu: 0.0.40
codegen_flags: <defaults>
</compile_context>

<pallas_src>
import functools

import jax
import jax.numpy as jnp
from jax.experimental import pallas as pl
from jax.experimental.pallas import tpu as pltpu

_LANES = 128
_MAX_BLOCK_ROWS = 2048  # 2048 * 128 * 4B = 1 MiB f32 per input block (0.5 MiB bf16)


def _round_up(x: int, m: int) -> int:
    return (x + m - 1) // m * m


def _jaccard_kernel(pred_ref, gt_ref, inter_ref, sum_ref, inter_acc, sum_acc,
                    *, apply_sigmoid: bool):
    k = pl.program_id(2)

    @pl.when(k == 0)
    def _():
        inter_acc[...] = jnp.zeros_like(inter_acc)
        sum_acc[...] = jnp.zeros_like(sum_acc)

    # (block_rows, 128) tile; cast to f32 after the load (native dtype in HBM).
    p = pred_ref[0].astype(jnp.float32)
    if apply_sigmoid:
        p = jax.nn.sigmoid(p)
    g = gt_ref[0].astype(jnp.float32)

    # Per-lane partial sums: pure VPU adds into an (8, 128) accumulator.
    inter_acc[...] += jnp.sum((p * g).reshape(-1, 8, _LANES), axis=0)
    sum_acc[...] += jnp.sum((p + g).reshape(-1, 8, _LANES), axis=0)

    @pl.when(k == pl.num_programs(2) - 1)
    def _():
        inter_ref[0, 0] = inter_acc[...]
        sum_ref[0, 0] = sum_acc[...]


def jaccard_loss(pred, gt, *, per_volume=False, apply_sigmoid=False):
    """Pallas-TPU JaccardLoss forward. pred/gt: NCHW with pred.shape[1] == 1."""
    assert pred.shape[1] == 1, "this loss works with a binary prediction"
    B = pred.shape[0]
    bs = B if per_volume else 1

    # Keep native dtypes (bf16 logits, int8/bool masks): no f32 copy in HBM.
    pred2 = pred.reshape(bs, -1)
    gt2 = gt.reshape(bs, -1)
    N = pred2.shape[1]

    rows = pl.cdiv(N, _LANES)
    block_rows = min(_MAX_BLOCK_ROWS, _round_up(rows, 8))
    k_total = pl.cdiv(rows, block_rows)

    # v7x megacore: with bs == 1 there is no batch parallelism, so split the
    # reduction across a 2-wide parallel axis (one half per TensorCore).  Only
    # enabled when it does not force additional padding (k_total even).
    n_split = 2 if (bs == 1 and k_total >= 2 and k_total % 2 == 0) else 1
    k_per_split = pl.cdiv(k_total, n_split)
    rows_padded = n_split * k_per_split * block_rows
    Np = rows_padded * _LANES

    if Np != N:
        pad = Np - N
        # Padded elements must contribute 0 to both sums.  With apply_sigmoid,
        # pad pred with a very negative value so sigmoid(pad) == 0.
        pred_pad_val = -1e30 if apply_sigmoid else 0
        pred2 = jnp.pad(pred2, ((0, 0), (0, pad)), constant_values=pred_pad_val)
        gt2 = jnp.pad(gt2, ((0, 0), (0, pad)), constant_values=0)

    pred3 = pred2.reshape(bs, rows_padded, _LANES)
    gt3 = gt2.reshape(bs, rows_padded, _LANES)

    grid = (bs, n_split, k_per_split)
    in_spec = pl.BlockSpec((1, block_rows, _LANES),
                           lambda b, s, k: (b, s * k_per_split + k, 0))
    out_spec = pl.BlockSpec((1, 1, 8, _LANES), lambda b, s, k: (b, s, 0, 0))
    part_shape = jax.ShapeDtypeStruct((bs, n_split, 8, _LANES), jnp.float32)

    kernel = functools.partial(_jaccard_kernel, apply_sigmoid=apply_sigmoid)

    inter_part, sum_part = pl.pallas_call(
        kernel,
        out_shape=(part_shape, part_shape),
        grid_spec=pltpu.PrefetchScalarGridSpec(
            num_scalar_prefetch=0,
            grid=grid,
            in_specs=[in_spec, in_spec],
            out_specs=[out_spec, out_spec],
            scratch_shapes=[
                pltpu.VMEM((8, _LANES), jnp.float32),  # per-lane intersection
                pltpu.VMEM((8, _LANES), jnp.float32),  # per-lane sum(p + g)
            ],
        ),
        compiler_params=pltpu.CompilerParams(
            dimension_semantics=("parallel", "parallel", "arbitrary"),
            vmem_limit_bytes=32 * 1024 * 1024),
    )(pred3, gt3, pred3, gt3)[0:2] if False else pl.pallas_call(
        kernel,
        out_shape=(part_shape, part_shape),
        grid_spec=pltpu.PrefetchScalarGridSpec(
            num_scalar_prefetch=0,
            grid=grid,
            in_specs=[in_spec, in_spec],
            out_specs=[out_spec, out_spec],
            scratch_shapes=[
                pltpu.VMEM((8, _LANES), jnp.float32),
                pltpu.VMEM((8, _LANES), jnp.float32),
            ],
        ),
        compiler_params=pltpu.CompilerParams(
            dimension_semantics=("parallel", "parallel", "arbitrary"),
            vmem_limit_bytes=32 * 1024 * 1024),
    )(pred3, gt3)

    # Tiny finalize (few hundred scalars): cross-lane reduce + eps math.
    eps = jnp.float32(1e-6)
    inter = jnp.sum(inter_part, axis=(1, 2, 3))
    total = jnp.sum(sum_part, axis=(1, 2, 3))
    union = total - inter
    return jnp.float32(1.0) - (inter + eps) / (union + eps)


def _jaccard_ref(pred, gt, *, per_volume=False, apply_sigmoid=False):
    """Pure-JAX reference mirroring the PyTorch forward."""
    bs = pred.shape[0] if per_volume else 1
    p = pred.reshape(bs, -1).astype(jnp.float32)
    if apply_sigmoid:
        p = jax.nn.sigmoid(p)
    g = gt.reshape(bs, -1).astype(jnp.float32)
    eps = 1e-6
    inter = jnp.sum(p * g, axis=1)
    union = jnp.sum(p + g, axis=1) - inter
    return 1.0 - (inter + eps) / (union + eps)


if __name__ == "__main__":
    key = jax.random.PRNGKey(0)
    kp, kg, kl = jax.random.split(key, 3)

    B, C, H, W = 2, 1, 16, 16

    # Config 1: defaults (per_volume=False, apply_sigmoid=False), f32 inputs.
    pred = jax.random.uniform(kp, (B, C, H, W), dtype=jnp.float32)
    gt = (jax.random.uniform(kg, (B, C, H, W)) > 0.5).astype(jnp.float32)
    loss = jax.block_until_ready(jaccard_loss(pred, gt))
    ref = _jaccard_ref(pred, gt)
    assert loss.shape == ref.shape
    assert jnp.allclose(loss, ref, atol=1e-5, rtol=1e-5), (loss, ref)

    # Config 2: per_volume=True, apply_sigmoid=True, native bf16 logits + uint8 mask.
    logits = jax.random.normal(kl, (B, C, H, W), dtype=jnp.float32).astype(jnp.bfloat16)
    mask = (jax.random.uniform(kg, (B, C, H, W)) > 0.5).astype(jnp.uint8)
    loss2 = jax.block_until_ready(
        jaccard_loss(logits, mask, per_volume=True, apply_sigmoid=True))
    ref2 = _jaccard_ref(logits, mask, per_volume=True, apply_sigmoid=True)
    assert loss2.shape == ref2.shape
    assert jnp.allclose(loss2, ref2, atol=2e-5, rtol=2e-5), (loss2, ref2)

    print("KERNEL_OK")
</pallas_src>

<mosaic_0001>
module attributes {stable_mosaic.version = 11 : i64} {
  func.func @_jaccard_kernel(%arg0: i32, %arg1: i32, %arg2: i32, %arg3: memref<1x8x128xf32, #tpu.memory_space<vmem>>, %arg4: memref<1x8x128xf32, #tpu.memory_space<vmem>>, %arg5: memref<1x1x8x128xf32, #tpu.memory_space<vmem>>, %arg6: memref<1x1x8x128xf32, #tpu.memory_space<vmem>>, %arg7: memref<8x128xf32, #tpu.memory_space<vmem>>, %arg8: memref<8x128xf32, #tpu.memory_space<vmem>>) attributes {dimension_semantics = [#tpu.dimension_semantics<parallel>, #tpu.dimension_semantics<parallel>, #tpu.dimension_semantics<arbitrary>], iteration_bounds = array<i64: 1, 1, 1>, scalar_prefetch = 0 : i64, scratch_operands = 2 : i64, tpu.core_type = #tpu.core_type<tc>, window_params = [{transform_indices = @transform_0, window_bounds = array<i64: 1, 8, 128>}, {transform_indices = @transform_1, window_bounds = array<i64: 1, 8, 128>}, {transform_indices = @transform_2, window_bounds = array<i64: 1, 1, 8, 128>}, {transform_indices = @transform_3, window_bounds = array<i64: 1, 1, 8, 128>}]} {
    %c0_i32 = arith.constant 0 : i32
    %0 = arith.cmpi eq, %arg2, %c0_i32 : i32
    %1 = arith.extui %0 : i1 to i32
    %c0_i32_0 = arith.constant 0 : i32
    %2 = arith.cmpi ne, %1, %c0_i32_0 : i32
    scf.if %2 {
      %cst_17 = arith.constant 0.000000e+00 : f32
      %22 = vector.broadcast %cst_17 : f32 to vector<8x128xf32>
      %c0_18 = arith.constant 0 : index
      %c0_19 = arith.constant 0 : index
      %23 = vector.load %arg7[%c0_18, %c0_19] : memref<8x128xf32, #tpu.memory_space<vmem>>, vector<8x128xf32>
      tpu.vector_store %arg7[%c0_18, %c0_19], %22 {strides = array<i32>} : memref<8x128xf32, #tpu.memory_space<vmem>>, vector<8x128xf32>,
      %cst_20 = arith.constant 0.000000e+00 : f32
      %24 = vector.broadcast %cst_20 : f32 to vector<8x128xf32>
      %c0_21 = arith.constant 0 : index
      %c0_22 = arith.constant 0 : index
      %25 = vector.load %arg8[%c0_21, %c0_22] : memref<8x128xf32, #tpu.memory_space<vmem>>, vector<8x128xf32>
      tpu.vector_store %arg8[%c0_21, %c0_22], %24 {strides = array<i32>} : memref<8x128xf32, #tpu.memory_space<vmem>>, vector<8x128xf32>,
    } else {
    }
    %c0 = arith.constant 0 : index
    %c0_1 = arith.constant 0 : index
    %c0_2 = arith.constant 0 : index
    %3 = vector.load %arg3[%c0, %c0_1, %c0_2] : memref<1x8x128xf32, #tpu.memory_space<vmem>>, vector<1x8x128xf32>
    %4 = vector.shape_cast %3 : vector<1x8x128xf32> to vector<8x128xf32>
    %c0_3 = arith.constant 0 : index
    %c0_4 = arith.constant 0 : index
    %c0_5 = arith.constant 0 : index
    %5 = vector.load %arg4[%c0_3, %c0_4, %c0_5] : memref<1x8x128xf32, #tpu.memory_space<vmem>>, vector<1x8x128xf32>
    %6 = vector.shape_cast %5 : vector<1x8x128xf32> to vector<8x128xf32>
    %c0_6 = arith.constant 0 : index
    %c0_7 = arith.constant 0 : index
    %7 = vector.load %arg7[%c0_6, %c0_7] : memref<8x128xf32, #tpu.memory_space<vmem>>, vector<8x128xf32>
    %8 = arith.mulf %4, %6 : vector<8x128xf32>
    %9 = vector.shape_cast %8 : vector<8x128xf32> to vector<1x8x128xf32>
    %cst = arith.constant dense<0.000000e+00> : vector<8x128xf32>
    %10 = vector.multi_reduction <add>, %9, %cst [0] : vector<1x8x128xf32> to vector<8x128xf32>
    %11 = arith.addf %7, %10 : vector<8x128xf32>
    %c0_8 = arith.constant 0 : index
    %c0_9 = arith.constant 0 : index
    %12 = vector.load %arg7[%c0_8, %c0_9] : memref<8x128xf32, #tpu.memory_space<vmem>>, vector<8x128xf32>
    tpu.vector_store %arg7[%c0_8, %c0_9], %11 {strides = array<i32>} : memref<8x128xf32, #tpu.memory_space<vmem>>, vector<8x128xf32>,
    %c0_10 = arith.constant 0 : index
    %c0_11 = arith.constant 0 : index
    %13 = vector.load %arg8[%c0_10, %c0_11] : memref<8x128xf32, #tpu.memory_space<vmem>>, vector<8x128xf32>
    %14 = arith.addf %4, %6 : vector<8x128xf32>
    %15 = vector.shape_cast %14 : vector<8x128xf32> to vector<1x8x128xf32>
    %cst_12 = arith.constant dense<0.000000e+00> : vector<8x128xf32>
    %16 = vector.multi_reduction <add>, %15, %cst_12 [0] : vector<1x8x128xf32> to vector<8x128xf32>
    %17 = arith.addf %13, %16 : vector<8x128xf32>
    %c0_13 = arith.constant 0 : index
    %c0_14 = arith.constant 0 : index
    %18 = vector.load %arg8[%c0_13, %c0_14] : memref<8x128xf32, #tpu.memory_space<vmem>>, vector<8x128xf32>
    tpu.vector_store %arg8[%c0_13, %c0_14], %17 {strides = array<i32>} : memref<8x128xf32, #tpu.memory_space<vmem>>, vector<8x128xf32>,
    %c0_i32_15 = arith.constant 0 : i32
    %19 = arith.cmpi eq, %arg2, %c0_i32_15 : i32
    %20 = arith.extui %19 : i1 to i32
    %c0_i32_16 = arith.constant 0 : i32
    %21 = arith.cmpi ne, %20, %c0_i32_16 : i32
    scf.if %21 {
      %c0_17 = arith.constant 0 : index
      %c0_18 = arith.constant 0 : index
      %22 = vector.load %arg7[%c0_17, %c0_18] : memref<8x128xf32, #tpu.memory_space<vmem>>, vector<8x128xf32>
      %c0_19 = arith.constant 0 : index
      %c0_20 = arith.constant 0 : index
      %c0_21 = arith.constant 0 : index
      %c0_22 = arith.constant 0 : index
      %23 = vector.load %arg5[%c0_19, %c0_20, %c0_21, %c0_22] : memref<1x1x8x128xf32, #tpu.memory_space<vmem>>, vector<1x1x8x128xf32>
      %24 = vector.shape_cast %23 : vector<1x1x8x128xf32> to vector<8x128xf32>
      %25 = vector.shape_cast %22 : vector<8x128xf32> to vector<1x1x8x128xf32>
      tpu.vector_store %arg5[%c0_19, %c0_20, %c0_21, %c0_22], %25 {strides = array<i32>} : memref<1x1x8x128xf32, #tpu.memory_space<vmem>>, vector<1x1x8x128xf32>,
      %c0_23 = arith.constant 0 : index
      %c0_24 = arith.constant 0 : index
      %26 = vector.load %arg8[%c0_23, %c0_24] : memref<8x128xf32, #tpu.memory_space<vmem>>, vector<8x128xf32>
      %c0_25 = arith.constant 0 : index
      %c0_26 = arith.constant 0 : index
      %c0_27 = arith.constant 0 : index
      %c0_28 = arith.constant 0 : index
      %27 = vector.load %arg6[%c0_25, %c0_26, %c0_27, %c0_28] : memref<1x1x8x128xf32, #tpu.memory_space<vmem>>, vector<1x1x8x128xf32>
      %28 = vector.shape_cast %27 : vector<1x1x8x128xf32> to vector<8x128xf32>
      %29 = vector.shape_cast %26 : vector<8x128xf32> to vector<1x1x8x128xf32>
      tpu.vector_store %arg6[%c0_25, %c0_26, %c0_27, %c0_28], %29 {strides = array<i32>} : memref<1x1x8x128xf32, #tpu.memory_space<vmem>>, vector<1x1x8x128xf32>,
    } else {
    }
    return
  }
  func.func @transform_0(%arg0: i32, %arg1: i32, %arg2: i32) -> (i32, i32, i32) {
    %c1_i32 = arith.constant 1 : i32
    %0 = arith.muli %arg1, %c1_i32 : i32
    %1 = arith.addi %0, %arg2 : i32
    %c0_i32 = arith.constant 0 : i32
    %c0_i32_0 = arith.constant 0 : i32
    return %arg0, %1, %c0_i32 : i32, i32, i32
  }
  func.func @transform_1(%arg0: i32, %arg1: i32, %arg2: i32) -> (i32, i32, i32) {
    %c1_i32 = arith.constant 1 : i32
    %0 = arith.muli %arg1, %c1_i32 : i32
    %1 = arith.addi %0, %arg2 : i32
    %c0_i32 = arith.constant 0 : i32
    %c0_i32_0 = arith.constant 0 : i32
    return %arg0, %1, %c0_i32 : i32, i32, i32
  }
  func.func @transform_2(%arg0: i32, %arg1: i32, %arg2: i32) -> (i32, i32, i32, i32) {
    %c0_i32 = arith.constant 0 : i32
    %c0_i32_0 = arith.constant 0 : i32
    %c0_i32_1 = arith.constant 0 : i32
    return %arg0, %arg1, %c0_i32, %c0_i32_0 : i32, i32, i32, i32
  }
  func.func @transform_3(%arg0: i32, %arg1: i32, %arg2: i32) -> (i32, i32, i32, i32) {
    %c0_i32 = arith.constant 0 : i32
    %c0_i32_0 = arith.constant 0 : i32
    %c0_i32_1 = arith.constant 0 : i32
    return %arg0, %arg1, %c0_i32, %c0_i32_0 : i32, i32, i32, i32
  }
}

</mosaic_0001>

<bundles_post_ra>
// kernel: tpu_custom_call.1
= control target key start
LH: loop header
LB: loop body
LE: loop exit
PB: predicated region body
PF: predicated region fallthrough
CT: control target
= control target key end

     0   :  { %9 = vsyncpa [#allocation5], 0  ;;  %s230_s0 = inlined_call_operand.hbm [shape: f32[1,8,128], index: 0, kind: input, shape index: {}]   ;;  %s231_s1 = inlined_call_operand.hbm [shape: f32[1,8,128], index: 1, kind: input, shape index: {}]   ;;  %s232_s2 = inlined_call_operand.hbm [shape: f32[1,1,8,128], index: 2, kind: output, shape index: {0}]   ;;  %s233_s3 = inlined_call_operand.hbm [shape: f32[1,1,8,128], index: 3, kind: output, shape index: {1}]  }
   0x1   :  { %10 = vsyncpa [#allocation8], 0 }
   0x2   :  { %11 = vsyncpa [#allocation6], 0 }
   0x3   :  { %12 = vsyncpa [#allocation11], 0  ;;  %s194_s12 = smov [#allocation4]   ;;  %s195_s14 = smov [#allocation7]  }
   0x4   :  { %s22_s13 = sshll.u32 %s194_s12, 4  ;;  %s35_s15 = sshll.u32 %s195_s14, 4  ;;  %s23_s13 = int_to_ptr.vmem [resolvable:$true] %s22_s13  ;;  %s36_s15 = int_to_ptr.vmem [resolvable:$true] %s35_s15 }
   0x5   :  { %s114_s16 = scalar_lea.vmem %s23_s13, 128  ;;  %p119_p1 = scmp.lt.s32.totalorder %s23_s13, %s23_s13 }
   0x6   :  { %p115_p0 = scmp.ne.s32.totalorder %s23_s13, %s114_s16  ;;  %p120_p2 = scmp.lt.s32.totalorder %s114_s16, %s114_s16 }
   0x8   :  { %p121_p3 = por %p120_p2, %p119_p1 }
   0xa   :  { %p122_p4 = pnand %p121_p3, %p115_p0 }
   0xc   :  { %125 = shalt.err (!%p122_p4)
}
   0xd   :  { %25 = dma.hbm_to_vmem [thread:$0]  %s230_s0, 128, %s23_s13, [#allocation5]  }
   0xe   :  { %s134_s19 = scalar_lea.vmem %s36_s15, 128  ;;  %p139_p6 = scmp.lt.s32.totalorder %s36_s15, %s36_s15 }
   0xf   :  { %p135_p5 = scmp.ne.s32.totalorder %s36_s15, %s134_s19  ;;  %p140_p7 = scmp.lt.s32.totalorder %s134_s19, %s134_s19 }
  0x11   :  { %p141_p8 = por %p140_p7, %p139_p6 }
  0x13   :  { %p142_p9 = pnand %p141_p8, %p135_p5 }
  0x15   :  { %145 = shalt.err (!%p142_p9)
}
  0x16   :  { %38 = dma.hbm_to_vmem [thread:$0]  %s231_s1, 128, %s36_s15, [#allocation8]  }
  0x17   :  { %186 = dma.done.wait [#allocation5], 128  }
  0x18   :  { %187 = vsyncadd [#allocation5], 4294967168 }
  0x19   :  { %188 = dma.done.wait [#allocation8], 128  }
  0x1a   :  { %189 = vsyncadd [#allocation8], 4294967168  ;;  %s196_s22 = smov [#allocation9]   ;;  %s197_s24 = smov [#allocation10]   ;;  %v53_v0 = vld [vmem:[#allocation4] sm:$0xff]  ;;  %v54_v1 = vld [vmem:[#allocation7] sm:$0xff] }
  0x1b   :  { %s78_s23 = sshll.u32 %s196_s22, 4  ;;  %s88_s25 = sshll.u32 %s197_s24, 4  ;;  %v56_v2 = vmul.f32 %v54_v1, %v53_v0  ;;  %v61_v3 = vadd.f32 %v54_v1, %v53_v0  ;;  %s79_s23 = int_to_ptr.vmem [resolvable:$true] %s78_s23  ;;  %s89_s25 = int_to_ptr.vmem [resolvable:$true] %s88_s25 }
  0x1c   :  { %s146_s0 = scalar_lea.vmem %s79_s23, 128  ;;  %p151_p11 = scmp.lt.s32.totalorder %s79_s23, %s79_s23 }
  0x1d   :  { %69 = vst [vmem:[#allocation9] sm:$0xff] %v56_v2  ;;  %71 = vst [vmem:[#allocation10] sm:$0xff] %v61_v3  ;;  %p147_p10 = scmp.ne.s32.totalorder %s79_s23, %s146_s0  ;;  %p152_p12 = scmp.lt.s32.totalorder %s146_s0, %s146_s0 }
  0x1f   :  { %p153_p13 = por %p152_p12, %p151_p11 }
  0x21   :  { %p154_p0 = pnand %p153_p13, %p147_p10 }
  0x23   :  { %157 = shalt.err (!%p154_p0)
}
  0x24   :  { %81 = dma.vmem_to_hbm [thread:$0]  %s79_s23, 128, %s232_s2, [#allocation6]  }
  0x25   :  { %s166_s27 = scalar_lea.vmem %s89_s25, 128  ;;  %p171_p2 = scmp.lt.s32.totalorder %s89_s25, %s89_s25 }
  0x26   :  { %p167_p1 = scmp.ne.s32.totalorder %s89_s25, %s166_s27  ;;  %p172_p3 = scmp.lt.s32.totalorder %s166_s27, %s166_s27 }
  0x28   :  { %p173_p4 = por %p172_p3, %p171_p2 }
  0x2a   :  { %p174_p5 = pnand %p173_p4, %p167_p1 }
  0x2c   :  { %177 = shalt.err (!%p174_p5)
}
  0x2d   :  { %91 = dma.vmem_to_hbm [thread:$0]  %s89_s25, 128, %s233_s3, [#allocation11]  }
  0x2e   :  { %190 = dma.done.wait [#allocation6], 128  }
  0x2f   :  { %191 = vsyncadd [#allocation6], 4294967168 }
  0x30   :  { %192 = dma.done.wait [#allocation11], 128  }
  0x31   :  { %193 = vsyncadd [#allocation11], 4294967168 }
  0x32   :  { %98 = vsyncpa [#allocation5], 1 }
  0x33   :  { %99 = vsyncpa [#allocation8], 1 }
  0x34   :  { %100 = vsyncpa [#allocation6], 1 }
  0x35   :  { %101 = vsyncpa [#allocation11], 1 }

</bundles_post_ra>
